<compile_context>
chip_gen: v6e
topology: v6e:2x2x1
jax: 0.10.0
libtpu: 0.0.40
codegen_flags: <defaults>
</compile_context>

<pallas_src>
import jax
import jax.numpy as jnp
from jax.experimental import pallas as pl
from jax.experimental.pallas import tpu as pltpu

# ---------------------------------------------------------------------------
# Config (matches SkyField defaults)
# ---------------------------------------------------------------------------
SH_LEVELS = 4
SH_DIM = SH_LEVELS ** 2            # 16
APP_DIM = 32                       # appearance_embedding_dim
IN_DIM = SH_DIM + APP_DIM          # 48 = rgb_head in_dim
WIDTH = 64                         # mlp_layer_width
OUT_DIM = 3                        # rgb
OUT_PAD = 8                        # final layer padded to 8 rows (sublane aligned)
DIR_ROWS = 8                       # packed slab: rows 0..2 = xyz, 3..7 = zero pad
PACK_ROWS = DIR_ROWS + APP_DIM     # 40
MAX_TILE = 2048                    # rows per grid step (sweepable 1024..4096)


def _sh16(x, y, z):
    """16 SH components (levels=4), nerfstudio coefficients.

    Works on any broadcast-compatible shapes (rows (1,T) in the kernel,
    columns (N,1) in the reference)."""
    xx, yy, zz = x * x, y * y, z * z
    return [
        jnp.full_like(x, 0.28209479177387814),
        0.4886025119029199 * y,
        0.4886025119029199 * z,
        0.4886025119029199 * x,
        1.0925484305920792 * x * y,
        1.0925484305920792 * y * z,
        0.9461746957575601 * zz - 0.31539156525252005,
        1.0925484305920792 * x * z,
        0.5462742152960396 * (xx - yy),
        0.5900435899266435 * y * (3.0 * xx - yy),
        2.890611442640554 * x * y * z,
        0.4570457994644658 * y * (5.0 * zz - 1.0),
        0.3731763325901154 * z * (5.0 * zz - 3.0),
        0.4570457994644658 * x * (5.0 * zz - 1.0),
        1.445305721320277 * z * (xx - yy),
        0.5900435899266435 * x * (xx - 3.0 * yy),
    ]


def sky_field_kernel(feat_ref, w1s_ref, w1a_ref, b1_ref, w2_ref, b2_ref,
                     w3_ref, b3_ref, out_ref):
    f32 = jnp.float32

    # get_normalized_directions: (d + 1) / 2   (rows 0..2 of the packed slab)
    nd = feat_ref[0:3, :] * 0.5 + 0.5                      # (3, T), lane-dense
    x, y, z = nd[0:1, :], nd[1:2, :], nd[2:3, :]

    # SHEncoding(levels=4): stack 16 lane-dense rows -> (16, T)
    sh_t = jnp.concatenate(_sh16(x, y, z), axis=0)         # (16, T) f32

    app_t = feat_ref[DIR_ROWS:PACK_ROWS, :]                # (32, T) f32

    # Layer 1, split into SH part + appearance part (never build the 48-wide
    # lane-axis concat). Weights are pre-transposed to [out, in], f32.
    h = jnp.dot(w1s_ref[...], sh_t, preferred_element_type=f32)
    h = h + jnp.dot(w1a_ref[...], app_t, preferred_element_type=f32)
    h = jnp.maximum(h + b1_ref[...], 0.0)                  # (64, T)

    # Layer 2
    h = jnp.dot(w2_ref[...], h, preferred_element_type=f32)
    h = jnp.maximum(h + b2_ref[...], 0.0)                  # (64, T)

    # Layer 3 (padded to 8 rows) + sigmoid; (8, T) is a lane-dense store.
    o = jnp.dot(w3_ref[...], h, preferred_element_type=f32)
    out_ref[...] = jax.nn.sigmoid(o + b3_ref[...])


@jax.jit
def sky_field_forward(directions, appearance_embedding, params):
    """directions: [N, S, 3], appearance_embedding: [N, S, APP_DIM]."""
    n = directions.shape[0]

    # rows per grid step; keep the grid long for large N (feeds both v7x TCs)
    tile = min(MAX_TILE, pl.cdiv(n, 128) * 128)
    n_pad = pl.cdiv(n, tile) * tile

    # ---- one-time layout prep (single fused XLA op; sanctioned pre-pack) ---
    dirs0 = directions[:, 0, :].astype(jnp.float32)            # [N, 3]
    app0 = appearance_embedding[:, 0, :].astype(jnp.float32)   # [N, 32]
    packed = jnp.concatenate(
        [dirs0.T,
         jnp.zeros((DIR_ROWS - 3, n), jnp.float32),   # sublane-align app rows
         app0.T],
        axis=0)                                                 # [40, N]
    packed = jnp.pad(packed, ((0, 0), (0, n_pad - n)))          # [40, Np]

    w1, b1, w2, b2, w3, b3 = params
    f32 = jnp.float32
    w1s = w1[:SH_DIM, :].T.astype(f32)                          # [64, 16]
    w1a = w1[SH_DIM:, :].T.astype(f32)                          # [64, 32]
    w2t = w2.T.astype(f32)                                      # [64, 64]
    w3t = jnp.zeros((OUT_PAD, WIDTH), f32).at[:OUT_DIM, :].set(
        w3.T.astype(f32))                                       # [8, 64]
    b1t = b1.reshape(WIDTH, 1).astype(f32)
    b2t = b2.reshape(WIDTH, 1).astype(f32)
    b3t = jnp.zeros((OUT_PAD, 1), f32).at[:OUT_DIM, :].set(
        b3.reshape(OUT_DIM, 1).astype(f32))

    const = lambda i: (0, 0)
    out_t = pl.pallas_call(
        sky_field_kernel,
        out_shape=jax.ShapeDtypeStruct((OUT_PAD, n_pad), jnp.float32),
        grid_spec=pltpu.PrefetchScalarGridSpec(
            num_scalar_prefetch=0,
            grid=(n_pad // tile,),
            in_specs=[
                pl.BlockSpec((PACK_ROWS, tile), lambda i: (0, i)),
                pl.BlockSpec((WIDTH, SH_DIM), const),
                pl.BlockSpec((WIDTH, APP_DIM), const),
                pl.BlockSpec((WIDTH, 1), const),
                pl.BlockSpec((WIDTH, WIDTH), const),
                pl.BlockSpec((WIDTH, 1), const),
                pl.BlockSpec((OUT_PAD, WIDTH), const),
                pl.BlockSpec((OUT_PAD, 1), const),
            ],
            out_specs=pl.BlockSpec((OUT_PAD, tile), lambda i: (0, i)),
        ),
        compiler_params=pltpu.CompilerParams(
            dimension_semantics=("parallel",)),
    )(packed, w1s, w1a, b1t, w2t, b2t, w3t, b3t)

    rgb = out_t[:OUT_DIM, :n].T                                 # [N, 3]
    return {"rgb": rgb}
    # TODO(synk): use_semantics=True branch (semantic_head MLP on `sh` only)
    # omitted -- default SkyField config has use_semantics=False.


def init_params(key):
    """Deterministic init mimicking torch.nn.Linear defaults."""
    ks = jax.random.split(key, 6)

    def linear(kw, kb, fan_in, fan_out):
        bound = 1.0 / jnp.sqrt(float(fan_in))
        w = jax.random.uniform(kw, (fan_in, fan_out), jnp.float32, -bound, bound)
        b = jax.random.uniform(kb, (1, fan_out), jnp.float32, -bound, bound)
        return w, b

    w1, b1 = linear(ks[0], ks[1], IN_DIM, WIDTH)
    w2, b2 = linear(ks[2], ks[3], WIDTH, WIDTH)
    w3, b3 = linear(ks[4], ks[5], WIDTH, OUT_DIM)
    return (w1, b1, w2, b2, w3, b3)


def reference_forward(directions, appearance_embedding, params):
    """Pure-JAX f32 reference for verification."""
    dirs = directions[:, 0, :]
    app = appearance_embedding[:, 0, :]
    nd = (dirs + 1.0) * 0.5
    sh = jnp.concatenate(_sh16(nd[:, 0:1], nd[:, 1:2], nd[:, 2:3]), axis=-1)
    feat = jnp.concatenate([sh, app], axis=-1)
    w1, b1, w2, b2, w3, b3 = params
    h = jnp.maximum(feat @ w1 + b1, 0.0)
    h = jnp.maximum(h @ w2 + b2, 0.0)
    return jax.nn.sigmoid(h @ w3 + b3)


if __name__ == "__main__":
    key = jax.random.PRNGKey(0)
    k_dir, k_app, k_par = jax.random.split(key, 3)

    N = 300          # rays (intentionally NOT a multiple of the tile)
    S = 4            # samples per ray (only sample 0 is used, per forward())

    raw = jax.random.normal(k_dir, (N, S, 3), jnp.float32)
    directions = raw / jnp.linalg.norm(raw, axis=-1, keepdims=True)  # unit dirs
    appearance = jax.random.normal(k_app, (N, S, APP_DIM), jnp.float32)
    params = init_params(k_par)

    out = sky_field_forward(directions, appearance, params)
    rgb = jax.block_until_ready(out["rgb"])

    ref = reference_forward(directions, appearance, params)
    assert rgb.shape == (N, OUT_DIM)
    # f32 operands with f32 accumulation -> tight tolerance vs f32 reference.
    err = float(jnp.max(jnp.abs(rgb - ref)))
    assert err < 1e-4, f"mismatch vs reference: max abs err {err}"

    print("KERNEL_OK")
</pallas_src>

<mosaic_0001>
module attributes {stable_mosaic.version = 11 : i64} {
  func.func @sky_field_kernel(%arg0: i32, %arg1: memref<40x384xf32, #tpu.memory_space<vmem>>, %arg2: memref<64x16xf32, #tpu.memory_space<vmem>>, %arg3: memref<64x32xf32, #tpu.memory_space<vmem>>, %arg4: memref<64x1xf32, #tpu.memory_space<vmem>>, %arg5: memref<64x64xf32, #tpu.memory_space<vmem>>, %arg6: memref<64x1xf32, #tpu.memory_space<vmem>>, %arg7: memref<8x64xf32, #tpu.memory_space<vmem>>, %arg8: memref<8x1xf32, #tpu.memory_space<vmem>>, %arg9: memref<8x384xf32, #tpu.memory_space<vmem>>) attributes {dimension_semantics = [#tpu.dimension_semantics<parallel>], iteration_bounds = array<i64: 1>, scalar_prefetch = 0 : i64, scratch_operands = 0 : i64, tpu.core_type = #tpu.core_type<tc>, window_params = [{transform_indices = @transform_0, window_bounds = array<i64: 40, 384>}, {pipeline_mode = #tpu.pipeline_mode<synchronous>, transform_indices = @transform_1, window_bounds = array<i64: 64, 16>}, {pipeline_mode = #tpu.pipeline_mode<synchronous>, transform_indices = @transform_2, window_bounds = array<i64: 64, 32>}, {pipeline_mode = #tpu.pipeline_mode<synchronous>, transform_indices = @transform_3, window_bounds = array<i64: 64, 1>}, {pipeline_mode = #tpu.pipeline_mode<synchronous>, transform_indices = @transform_4, window_bounds = array<i64: 64, 64>}, {pipeline_mode = #tpu.pipeline_mode<synchronous>, transform_indices = @transform_5, window_bounds = array<i64: 64, 1>}, {pipeline_mode = #tpu.pipeline_mode<synchronous>, transform_indices = @transform_6, window_bounds = array<i64: 8, 64>}, {pipeline_mode = #tpu.pipeline_mode<synchronous>, transform_indices = @transform_7, window_bounds = array<i64: 8, 1>}, {transform_indices = @transform_8, window_bounds = array<i64: 8, 384>}]} {
    %c0 = arith.constant 0 : index
    %c0_0 = arith.constant 0 : index
    %0 = vector.load %arg1[%c0, %c0_0] : memref<40x384xf32, #tpu.memory_space<vmem>>, vector<3x384xf32>
    %cst = arith.constant 5.000000e-01 : f32
    %1 = vector.broadcast %cst : f32 to vector<3x384xf32>
    %2 = arith.mulf %0, %1 : vector<3x384xf32>
    %cst_1 = arith.constant 5.000000e-01 : f32
    %3 = vector.broadcast %cst_1 : f32 to vector<3x384xf32>
    %4 = arith.addf %2, %3 : vector<3x384xf32>
    %5 = vector.extract_strided_slice %4 {offsets = [0, 0], sizes = [1, 384], strides = [1, 1]} : vector<3x384xf32> to vector<1x384xf32>
    %6 = vector.extract_strided_slice %4 {offsets = [1, 0], sizes = [1, 384], strides = [1, 1]} : vector<3x384xf32> to vector<1x384xf32>
    %7 = vector.extract_strided_slice %4 {offsets = [2, 0], sizes = [1, 384], strides = [1, 1]} : vector<3x384xf32> to vector<1x384xf32>
    %8 = arith.mulf %5, %5 : vector<1x384xf32>
    %9 = arith.mulf %6, %6 : vector<1x384xf32>
    %10 = arith.mulf %7, %7 : vector<1x384xf32>
    %cst_2 = arith.constant 0.282094806 : f32
    %11 = vector.broadcast %cst_2 : f32 to vector<1x384xf32>
    %cst_3 = arith.constant 0.488602519 : f32
    %12 = vector.broadcast %cst_3 : f32 to vector<1x384xf32>
    %13 = arith.mulf %12, %6 : vector<1x384xf32>
    %cst_4 = arith.constant 0.488602519 : f32
    %14 = vector.broadcast %cst_4 : f32 to vector<1x384xf32>
    %15 = arith.mulf %14, %7 : vector<1x384xf32>
    %cst_5 = arith.constant 0.488602519 : f32
    %16 = vector.broadcast %cst_5 : f32 to vector<1x384xf32>
    %17 = arith.mulf %16, %5 : vector<1x384xf32>
    %cst_6 = arith.constant 1.09254849 : f32
    %18 = vector.broadcast %cst_6 : f32 to vector<1x384xf32>
    %19 = arith.mulf %18, %5 : vector<1x384xf32>
    %20 = arith.mulf %19, %6 : vector<1x384xf32>
    %cst_7 = arith.constant 1.09254849 : f32
    %21 = vector.broadcast %cst_7 : f32 to vector<1x384xf32>
    %22 = arith.mulf %21, %6 : vector<1x384xf32>
    %23 = arith.mulf %22, %7 : vector<1x384xf32>
    %cst_8 = arith.constant 0.946174681 : f32
    %24 = vector.broadcast %cst_8 : f32 to vector<1x384xf32>
    %25 = arith.mulf %24, %10 : vector<1x384xf32>
    %cst_9 = arith.constant 0.31539157 : f32
    %26 = vector.broadcast %cst_9 : f32 to vector<1x384xf32>
    %27 = arith.subf %25, %26 : vector<1x384xf32>
    %cst_10 = arith.constant 1.09254849 : f32
    %28 = vector.broadcast %cst_10 : f32 to vector<1x384xf32>
    %29 = arith.mulf %28, %5 : vector<1x384xf32>
    %30 = arith.mulf %29, %7 : vector<1x384xf32>
    %31 = arith.subf %8, %9 : vector<1x384xf32>
    %cst_11 = arith.constant 0.546274245 : f32
    %32 = vector.broadcast %cst_11 : f32 to vector<1x384xf32>
    %33 = arith.mulf %32, %31 : vector<1x384xf32>
    %cst_12 = arith.constant 0.590043604 : f32
    %34 = vector.broadcast %cst_12 : f32 to vector<1x384xf32>
    %35 = arith.mulf %34, %6 : vector<1x384xf32>
    %cst_13 = arith.constant 3.000000e+00 : f32
    %36 = vector.broadcast %cst_13 : f32 to vector<1x384xf32>
    %37 = arith.mulf %36, %8 : vector<1x384xf32>
    %38 = arith.subf %37, %9 : vector<1x384xf32>
    %39 = arith.mulf %35, %38 : vector<1x384xf32>
    %cst_14 = arith.constant 2.89061141 : f32
    %40 = vector.broadcast %cst_14 : f32 to vector<1x384xf32>
    %41 = arith.mulf %40, %5 : vector<1x384xf32>
    %42 = arith.mulf %41, %6 : vector<1x384xf32>
    %43 = arith.mulf %42, %7 : vector<1x384xf32>
    %cst_15 = arith.constant 0.457045794 : f32
    %44 = vector.broadcast %cst_15 : f32 to vector<1x384xf32>
    %45 = arith.mulf %44, %6 : vector<1x384xf32>
    %cst_16 = arith.constant 5.000000e+00 : f32
    %46 = vector.broadcast %cst_16 : f32 to vector<1x384xf32>
    %47 = arith.mulf %46, %10 : vector<1x384xf32>
    %cst_17 = arith.constant 1.000000e+00 : f32
    %48 = vector.broadcast %cst_17 : f32 to vector<1x384xf32>
    %49 = arith.subf %47, %48 : vector<1x384xf32>
    %50 = arith.mulf %45, %49 : vector<1x384xf32>
    %cst_18 = arith.constant 0.373176336 : f32
    %51 = vector.broadcast %cst_18 : f32 to vector<1x384xf32>
    %52 = arith.mulf %51, %7 : vector<1x384xf32>
    %cst_19 = arith.constant 5.000000e+00 : f32
    %53 = vector.broadcast %cst_19 : f32 to vector<1x384xf32>
    %54 = arith.mulf %53, %10 : vector<1x384xf32>
    %cst_20 = arith.constant 3.000000e+00 : f32
    %55 = vector.broadcast %cst_20 : f32 to vector<1x384xf32>
    %56 = arith.subf %54, %55 : vector<1x384xf32>
    %57 = arith.mulf %52, %56 : vector<1x384xf32>
    %cst_21 = arith.constant 0.457045794 : f32
    %58 = vector.broadcast %cst_21 : f32 to vector<1x384xf32>
    %59 = arith.mulf %58, %5 : vector<1x384xf32>
    %cst_22 = arith.constant 5.000000e+00 : f32
    %60 = vector.broadcast %cst_22 : f32 to vector<1x384xf32>
    %61 = arith.mulf %60, %10 : vector<1x384xf32>
    %cst_23 = arith.constant 1.000000e+00 : f32
    %62 = vector.broadcast %cst_23 : f32 to vector<1x384xf32>
    %63 = arith.subf %61, %62 : vector<1x384xf32>
    %64 = arith.mulf %59, %63 : vector<1x384xf32>
    %cst_24 = arith.constant 1.44530571 : f32
    %65 = vector.broadcast %cst_24 : f32 to vector<1x384xf32>
    %66 = arith.mulf %65, %7 : vector<1x384xf32>
    %67 = arith.subf %8, %9 : vector<1x384xf32>
    %68 = arith.mulf %66, %67 : vector<1x384xf32>
    %cst_25 = arith.constant 0.590043604 : f32
    %69 = vector.broadcast %cst_25 : f32 to vector<1x384xf32>
    %70 = arith.mulf %69, %5 : vector<1x384xf32>
    %cst_26 = arith.constant 3.000000e+00 : f32
    %71 = vector.broadcast %cst_26 : f32 to vector<1x384xf32>
    %72 = arith.mulf %71, %9 : vector<1x384xf32>
    %73 = arith.subf %8, %72 : vector<1x384xf32>
    %74 = arith.mulf %70, %73 : vector<1x384xf32>
    %75 = tpu.concatenate %11, %13, %15, %17, %20, %23, %27, %30, %33, %39, %43, %50, %57, %64, %68, %74 in 0 : vector<1x384xf32>, vector<1x384xf32>, vector<1x384xf32>, vector<1x384xf32>, vector<1x384xf32>, vector<1x384xf32>, vector<1x384xf32>, vector<1x384xf32>, vector<1x384xf32>, vector<1x384xf32>, vector<1x384xf32>, vector<1x384xf32>, vector<1x384xf32>, vector<1x384xf32>, vector<1x384xf32>, vector<1x384xf32> -> vector<16x384xf32>
    %c8 = arith.constant 8 : index
    %c0_27 = arith.constant 0 : index
    %76 = vector.load %arg1[%c8, %c0_27] : memref<40x384xf32, #tpu.memory_space<vmem>>, vector<32x384xf32>
    %c0_28 = arith.constant 0 : index
    %c0_29 = arith.constant 0 : index
    %77 = vector.load %arg2[%c0_28, %c0_29] : memref<64x16xf32, #tpu.memory_space<vmem>>, vector<64x16xf32>
    %cst_30 = arith.constant dense<0.000000e+00> : vector<64x384xf32>
    %78 = tpu.matmul %77, %75, %cst_30 {dimension_numbers = #tpu.dot_dimension_numbers<[1], [0], [0], [1], [0, 0, 1, 1], [], []>} : vector<64x16xf32>, vector<16x384xf32>, vector<64x384xf32> -> vector<64x384xf32>
    %c0_31 = arith.constant 0 : index
    %c0_32 = arith.constant 0 : index
    %79 = vector.load %arg3[%c0_31, %c0_32] : memref<64x32xf32, #tpu.memory_space<vmem>>, vector<64x32xf32>
    %cst_33 = arith.constant dense<0.000000e+00> : vector<64x384xf32>
    %80 = tpu.matmul %79, %76, %cst_33 {dimension_numbers = #tpu.dot_dimension_numbers<[1], [0], [0], [1], [0, 0, 1, 1], [], []>} : vector<64x32xf32>, vector<32x384xf32>, vector<64x384xf32> -> vector<64x384xf32>
    %81 = arith.addf %78, %80 : vector<64x384xf32>
    %c0_34 = arith.constant 0 : index
    %c0_35 = arith.constant 0 : index
    %82 = vector.load %arg4[%c0_34, %c0_35] : memref<64x1xf32, #tpu.memory_space<vmem>>, vector<64x1xf32>
    %83 = vector.broadcast %82 : vector<64x1xf32> to vector<64x384xf32>
    %84 = arith.addf %81, %83 : vector<64x384xf32>
    %cst_36 = arith.constant 0.000000e+00 : f32
    %85 = vector.broadcast %cst_36 : f32 to vector<64x384xf32>
    %86 = arith.maximumf %84, %85 : vector<64x384xf32>
    %c0_37 = arith.constant 0 : index
    %c0_38 = arith.constant 0 : index
    %87 = vector.load %arg5[%c0_37, %c0_38] : memref<64x64xf32, #tpu.memory_space<vmem>>, vector<64x64xf32>
    %cst_39 = arith.constant dense<0.000000e+00> : vector<64x384xf32>
    %88 = tpu.matmul %87, %86, %cst_39 {dimension_numbers = #tpu.dot_dimension_numbers<[1], [0], [0], [1], [0, 0, 1, 1], [], []>} : vector<64x64xf32>, vector<64x384xf32>, vector<64x384xf32> -> vector<64x384xf32>
    %c0_40 = arith.constant 0 : index
    %c0_41 = arith.constant 0 : index
    %89 = vector.load %arg6[%c0_40, %c0_41] : memref<64x1xf32, #tpu.memory_space<vmem>>, vector<64x1xf32>
    %90 = vector.broadcast %89 : vector<64x1xf32> to vector<64x384xf32>
    %91 = arith.addf %88, %90 : vector<64x384xf32>
    %cst_42 = arith.constant 0.000000e+00 : f32
    %92 = vector.broadcast %cst_42 : f32 to vector<64x384xf32>
    %93 = arith.maximumf %91, %92 : vector<64x384xf32>
    %c0_43 = arith.constant 0 : index
    %c0_44 = arith.constant 0 : index
    %94 = vector.load %arg7[%c0_43, %c0_44] : memref<8x64xf32, #tpu.memory_space<vmem>>, vector<8x64xf32>
    %cst_45 = arith.constant dense<0.000000e+00> : vector<8x384xf32>
    %95 = tpu.matmul %94, %93, %cst_45 {dimension_numbers = #tpu.dot_dimension_numbers<[1], [0], [0], [1], [0, 0, 1, 1], [], []>} : vector<8x64xf32>, vector<64x384xf32>, vector<8x384xf32> -> vector<8x384xf32>
    %c0_46 = arith.constant 0 : index
    %c0_47 = arith.constant 0 : index
    %96 = vector.load %arg8[%c0_46, %c0_47] : memref<8x1xf32, #tpu.memory_space<vmem>>, vector<8x1xf32>
    %97 = vector.broadcast %96 : vector<8x1xf32> to vector<8x384xf32>
    %98 = arith.addf %95, %97 : vector<8x384xf32>
    %99 = arith.negf %98 : vector<8x384xf32>
    %100 = math.exp %99 : vector<8x384xf32>
    %cst_48 = arith.constant 1.000000e+00 : f32
    %101 = vector.broadcast %cst_48 : f32 to vector<8x384xf32>
    %102 = arith.addf %101, %100 : vector<8x384xf32>
    %103 = arith.divf %101, %102 : vector<8x384xf32>
    %c0_49 = arith.constant 0 : index
    %c0_50 = arith.constant 0 : index
    %104 = vector.load %arg9[%c0_49, %c0_50] : memref<8x384xf32, #tpu.memory_space<vmem>>, vector<8x384xf32>
    tpu.vector_store %arg9[%c0_49, %c0_50], %103 {strides = array<i32>} : memref<8x384xf32, #tpu.memory_space<vmem>>, vector<8x384xf32>,
    return
  }
  func.func @transform_0(%arg0: i32) -> (i32, i32) {
    %c0_i32 = arith.constant 0 : i32
    %c0_i32_0 = arith.constant 0 : i32
    return %c0_i32, %arg0 : i32, i32
  }
  func.func @transform_1(%arg0: i32) -> (i32, i32) {
    %c0_i32 = arith.constant 0 : i32
    %c0_i32_0 = arith.constant 0 : i32
    %c0_i32_1 = arith.constant 0 : i32
    return %c0_i32, %c0_i32_0 : i32, i32
  }
  func.func @transform_2(%arg0: i32) -> (i32, i32) {
    %c0_i32 = arith.constant 0 : i32
    %c0_i32_0 = arith.constant 0 : i32
    %c0_i32_1 = arith.constant 0 : i32
    return %c0_i32, %c0_i32_0 : i32, i32
  }
  func.func @transform_3(%arg0: i32) -> (i32, i32) {
    %c0_i32 = arith.constant 0 : i32
    %c0_i32_0 = arith.constant 0 : i32
    %c0_i32_1 = arith.constant 0 : i32
    return %c0_i32, %c0_i32_0 : i32, i32
  }
  func.func @transform_4(%arg0: i32) -> (i32, i32) {
    %c0_i32 = arith.constant 0 : i32
    %c0_i32_0 = arith.constant 0 : i32
    %c0_i32_1 = arith.constant 0 : i32
    return %c0_i32, %c0_i32_0 : i32, i32
  }
  func.func @transform_5(%arg0: i32) -> (i32, i32) {
    %c0_i32 = arith.constant 0 : i32
    %c0_i32_0 = arith.constant 0 : i32
    %c0_i32_1 = arith.constant 0 : i32
    return %c0_i32, %c0_i32_0 : i32, i32
  }
  func.func @transform_6(%arg0: i32) -> (i32, i32) {
    %c0_i32 = arith.constant 0 : i32
    %c0_i32_0 = arith.constant 0 : i32
    %c0_i32_1 = arith.constant 0 : i32
    return %c0_i32, %c0_i32_0 : i32, i32
  }
  func.func @transform_7(%arg0: i32) -> (i32, i32) {
    %c0_i32 = arith.constant 0 : i32
    %c0_i32_0 = arith.constant 0 : i32
    %c0_i32_1 = arith.constant 0 : i32
    return %c0_i32, %c0_i32_0 : i32, i32
  }
  func.func @transform_8(%arg0: i32) -> (i32, i32) {
    %c0_i32 = arith.constant 0 : i32
    %c0_i32_0 = arith.constant 0 : i32
    return %c0_i32, %arg0 : i32, i32
  }
}

</mosaic_0001>

<bundles_post_ra>
// kernel: sky_field_forward.1
= control target key start
LH: loop header
LB: loop body
LE: loop exit
PB: predicated region body
PF: predicated region fallthrough
CT: control target
= control target key end

     0   :  { %v1653_v3 = vmov 0.0   ;;  %vm355_vm0 = vcmask 261120   ;;  %vm278_vm1 = vcmask 1040384   ;;  %vm282_vm2 = vcmask 1041408   ;;  %s2282_s0 = inlined_call_operand.vmem [shape: f32[40,384], index: 0, kind: input, shape index: {}]   ;;  %s2283_s2 = inlined_call_operand.vmem [shape: f32[64,32], index: 2, kind: input, shape index: {}]   ;;  %s2284_s3 = inlined_call_operand.vmem [shape: f32[64,1], index: 3, kind: input, shape index: {}]   ;;  %s2285_s1 = inlined_call_operand.vmem [shape: f32[64,16], index: 1, kind: input, shape index: {}]   ;;  %s2286_s5 = inlined_call_operand.vmem [shape: f32[64,1], index: 5, kind: input, shape index: {}]   ;;  %s2287_s7 = inlined_call_operand.vmem [shape: f32[8,1], index: 7, kind: input, shape index: {}]   ;;  %s2288_s4 = inlined_call_operand.vmem [shape: f32[64,64], index: 4, kind: input, shape index: {}]   ;;  %s2289_s6 = inlined_call_operand.vmem [shape: f32[8,64], index: 6, kind: input, shape index: {}]   ;;  %s2290_s8 = inlined_call_operand.vmem [shape: f32[8,384], index: 8, kind: output, shape index: {}]  }
   0x1   :  { %v337_v0 = vld [vmem:[%s2282_s0 + $0x68] sm:$0xff]  ;;  %v336_v1 = vld [vmem:[%s2282_s0 + $0x60] sm:$0xff]  ;;  %v334_v2 = vld [vmem:[%s2282_s0 + $0x50] sm:$0xff]  ;;  %444 = vmatprep.mubr.f32.mxu0 %v1653_v3  ;;  %480 = vmatprep.mubr.f32.mxu1 %v1653_v3  ;;  %vm286_vm3 = vcmask 1042432   ;;  %v1654_v33 = vmov 0   ;;  %vm290_vm4 = vcmask 1043456  }
   0x2   :  { %404 = vmatprep.subr.mxu0 %v337_v0  ;;  %1628 = vmatprep.subr.mxu1 %v337_v0  ;;  %v333_v4 = vld [vmem:[%s2282_s0 + $0x48] sm:$0xff]  ;;  %v331_v5 = vld [vmem:[%s2282_s0 + $0x38] sm:$0xff]  ;;  %v330_v6 = vld [vmem:[%s2282_s0 + $0x30] sm:$0xff]  ;;  %vm294_vm5 = vcmask 1044480   ;;  %vm298_vm6 = vcmask 1045504   ;;  %vm302_vm7 = vcmask 1046528  }
   0x3   :  { %405 = vmatpush1.msra.mxu0 %v336_v1  ;;  %1632 = vmatpush1.msra.mxu1 %v336_v1  ;;  %v328_v7 = vld [vmem:[%s2282_s0 + $0x20] sm:$0xff]  ;;  %v327_v8 = vld [vmem:[%s2282_s0 + $0x18] sm:$0xff]  ;;  %v1735_v10 = vld [vmem:[%s2283_s2 + $0x30] sm:$0xff]  ;;  %vm598_vm8 = vcmask 130048   ;;  %vm993_vm9 = vcmask 523264   ;;  %vm1655_vm10 = vmmov 0  }
   0x4   :  { %406 = vmatprep.subr.mxu0 %v334_v2  ;;  %1629 = vmatprep.subr.mxu1 %v334_v2  ;;  %v1730_v9 = vld [vmem:[%s2283_s2] sm:$0xff]  ;;  %v30_v11 = vld [vmem:[%s2282_s0 + $0x8] sm:$0x7]  ;;  %v338_v13 = vld [vmem:[%s2282_s0 + $0x70] sm:$0xff] }
   0x5   :  { %407 = vmatpush1.msra.mxu0 %v333_v4  ;;  %1633 = vmatpush1.msra.mxu1 %v333_v4  ;;  %v29_v12 = vld [vmem:[%s2282_s0] sm:$0x7]  ;;  %v33_v14 = vmul.f32 0.5, %v30_v11  ;;  %v31_v16 = vld [vmem:[%s2282_s0 + $0x10] sm:$0x7]  ;;  %v335_v18 = vld [vmem:[%s2282_s0 + $0x58] sm:$0xff] }
   0x6   :  { %408 = vmatprep.subr.mxu0 %v331_v5  ;;  %1630 = vmatprep.subr.mxu1 %v331_v5  ;;  %v32_v15 = vmul.f32 0.5, %v29_v12  ;;  %v34_v17 = vmul.f32 0.5, %v31_v16  ;;  %v348_v21 = vld [vmem:[%s2283_s2 + $0x8] sm:$0xff]  ;;  %v1770_v23 = vld [vmem:[%s2283_s2 + $0x38] sm:$0xff]  ;;  %v332_v24 = vld [vmem:[%s2282_s0 + $0x40] sm:$0xff] }
   0x7   :  { %409 = vmatpush1.msra.mxu0 %v330_v6  ;;  %1634 = vmatpush1.msra.mxu1 %v330_v6  ;;  %v1756_v19 = vadd.f32 0.5, %v33_v14  ;;  %v329_v34 = vld [vmem:[%s2282_s0 + $0x28] sm:$0xff]  ;;  %v349_v39 = vld [vmem:[%s2283_s2 + $0x10] sm:$0xff]  ;;  %v848_v52 = vld [vmem:[%s2284_s3 + $0x38] sm:$0xff] }
   0x8   :  { %410 = vmatprep.subr.mxu0 %v328_v7  ;;  %1631 = vmatprep.subr.mxu1 %v328_v7  ;;  %v1758_v20 = vadd.f32 0.5, %v32_v15  ;;  %v1764_v22 = vadd.f32 0.5, %v34_v17  ;;  %v350_v57 = vld [vmem:[%s2283_s2 + $0x18] sm:$0xff]  ;;  %v846_v62 = vld [vmem:[%s2284_s3 + $0x28] sm:$0xff] }
   0x9   :  { %411 = vmatpush1.msra.mxu0 %v327_v8  ;;  %1635 = vmatpush1.msra.mxu1 %v327_v8  ;;  %v1777_v25 = vmul.f32 %v1756_v19, %v1756_v19  ;;  %v51_v26 = vrot.slane %v1756_v19, 1  ;;  %v66_v27 = vrot.slane %v1756_v19, 2  ;;  %v1782_v28 = vmul.f32 0.5900436, %v1756_v19  ;;  %v351_v8 = vld [vmem:[%s2283_s2 + $0x20] sm:$0xff] }
   0xa   :  { %1445 = vmatmul.mubr.msk.f32.vlgmr.msra.gmra.mxu0 %vm355_vm0, %v1730_v9  ;;  %1451 = vmatmul.mubr.msk.f32.vlgmr.msra.gmra.mxu1 %vm355_vm0, %v1735_v10  ;;  %v111_v29 = vmul.f32 2.8906114, %v1756_v19  ;;  %v120_v30 = vmul.f32 0.4570458, %v1756_v19  ;;  %v141_v31 = vmul.f32 0.37317634, %v1756_v19  ;;  %v1789_v32 = vmul.f32 %v1758_v20, %v1758_v20 }
   0xb   :  { %1545 = vmatprep.subr.mxu1 %v338_v13  ;;  %450 = vmatprep.mubr.f32.mxu0 %v1653_v3  ;;  %v78_v35 = vrot.slane %v1777_v25, 1  ;;  %v93_v36 = vmul.f32 3.0, %v1777_v25  ;;  %v123_v37 = vmul.f32 5.0, %v1777_v25  ;;  %v159_v38 = vmul.f32 1.4453057, %v1756_v19 }
   0xc   :  { %1546 = vmatpush3.msra.mxu1 %v338_v13  ;;  %486 = vmatprep.mubr.f32.mxu1 %v1653_v3  ;;  %v114_v40 = vmul.f32 %v111_v29, %v51_v26  ;;  %v50_v41 = vrot.slane %v1758_v20, 1  ;;  %v65_v42 = vrot.slane %v1758_v20, 2  ;;  %v77_v43 = vrot.slane %v1789_v32, 1 }
   0xd   :  { %1547 = vmatprep.subr.mxu1 %v335_v18  ;;  %1639 = vset.pattern.permute.xlu0 %v1654_v33  ;;  %v84_v44 = vsub.f32 %v1777_v25, %v78_v35  ;;  %v96_v45 = vsub.f32 %v93_v36, %v78_v35  ;;  %v1440_v46 = vadd.f32 -1.0, %v123_v37  ;;  %v1443_v47 = vadd.f32 -3.0, %v123_v37  ;;  %v844_v37 = vld [vmem:[%s2284_s3 + $0x18] sm:$0xff] }
   0xe   :  { %1548 = vmatpush3.msra.mxu1 %v335_v18  ;;  %1446 = vmatmul.mubr.msk.f32.gmra.mxu0 %vm355_vm0, %v348_v21  ;;  %v117_v48 = vmul.f32 %v114_v40, %v66_v27  ;;  %v177_v49 = vrot.slane %v93_v36, 1  ;;  %v1816_v50 = vsub.f32 %v1789_v32, %v77_v43  ;;  %v1819_v51 = vmul.f32 0.5900436, %v1758_v20 }
   0xf   :  { %1452 = vmatmul.mubr.msk.f32.gmra.mxu1 %vm355_vm0, %v1770_v23  ;;  %1549 = vmatprep.subr.mxu1 %v332_v24  ;;  %v87_v53 = vmul.f32 0.54627424, %v84_v44  ;;  %v102_v54 = vrot.slane %v96_v45, 7  ;;  %v132_v55 = vrot.slane %v1440_v46, 1  ;;  %v147_v56 = vmul.f32 %v1443_v47, %v141_v31  ;;  %v352_v31 = vld [vmem:[%s2283_s2 + $0x28] sm:$0xff] }
  0x10   :  { %1550 = vmatpush3.msra.mxu1 %v332_v24  ;;  %456 = vmatprep.mubr.f32.mxu0 %v1653_v3  ;;  %v150_v58 = vrot.slane %v1440_v46, 2  ;;  %v165_v59 = vrot.slane %v84_v44, 6  ;;  %v183_v60 = vsub.f32 %v1777_v25, %v177_v49  ;;  %v228_v61 = vrot.slane %v117_v48, 6 }
  0x11   :  { %1551 = vmatprep.subr.mxu1 %v329_v34  ;;  %1553 = vmatprep.mubr.msk.f32.mxu1 %vm355_vm0, %v1730_v9  ;;  %v108_v63 = vmul.f32 %v102_v54, %v1782_v28  ;;  %v138_v0 = vmul.f32 %v132_v55, %v120_v30  ;;  %v246_v1 = vrot.slane %v147_v56, 6  ;;  %v1837_v2 = vmul.f32 0.54627424, %v1816_v50  ;;  %v847_v9 = vld [vmem:[%s2284_s3 + $0x30] sm:$0xff] }
  0x12   :  { %1552 = vmatpush3.msra.mxu1 %v329_v34  ;;  %1447 = vmatmul.mubr.msk.f32.gmra.mxu0 %vm355_vm0, %v349_v39  ;;  %v156_v4 = vmul.f32 %v150_v58, %v120_v30  ;;  %v171_v5 = vmul.f32 %v165_v59, %v159_v38  ;;  %v186_v6 = vmul.f32 %v183_v60, %v1782_v28  ;;  %v92_v7 = vmul.f32 3.0, %v1789_v32  ;;  %v843_v58 = vld [vmem:[%s2284_s3 + $0x10] sm:$0xff] }
  0x13   :  { %1554 = vmatmul.mubr.msk.f32.vlgmr.msra.gmra.mxu1 %vm355_vm0, %v348_v21  ;;  %462 = vmatprep.mubr.f32.mxu0 %v1653_v3  ;;  %v237_v11 = vrot.slane %v138_v0, 6  ;;  %v307_v12 = vsel %vm278_vm1, %v87_v53, %v108_v63  ;;  %v110_v13 = vmul.f32 2.8906114, %v1758_v20  ;;  %v119_v14 = vmul.f32 0.4570458, %v1758_v20  ;;  %v845_v21 = vld [vmem:[%s2284_s3 + $0x20] sm:$0xff] }
  0x14   :  { %1556 = vmatprep.mubr.msk.f32.mxu1 %vm355_vm0, %v349_v39  ;;  %886 = vperm.xlu0 %1639, %v848_v52   ;;  %v255_v15 = vrot.slane %v156_v4, 3  ;;  %v264_v16 = vrot.slane %v171_v5, 4  ;;  %v273_v17 = vrot.slane %v186_v6, 1  ;;  %v310_v18 = vsel %vm282_vm2, %v307_v12, %v228_v61  ;;  %v1886_v53 = vld [vmem:[%s2285_s1] sm:$0xff] }
  0x15   :  { %1640 = vset.pattern.permute.xlu1 %v1654_v33  ;;  %v313_v24 = vsel %vm286_vm3, %v310_v18, %v237_v11  ;;  %v95_v28 = vsub.f32 %v92_v7, %v77_v43  ;;  %v113_v29 = vmul.f32 %v110_v13, %v50_v41  ;;  %v122_v30 = vmul.f32 5.0, %v1789_v32 }
  0x16   :  { %1448 = vmatmul.mubr.msk.f32.gmra.mxu0 %vm355_vm0, %v350_v57  ;;  %876 = vperm.xlu1 %1640, %v846_v62   ;;  %v316_v33 = vsel %vm290_vm4, %v313_v24, %v246_v1  ;;  %v140_v34 = vmul.f32 0.37317634, %v1758_v20  ;;  %v158_v35 = vmul.f32 1.4453057, %v1758_v20  ;;  %v164_v36 = vrot.slane %v1816_v50, 6  ;;  %v842_v62 = vld [vmem:[%s2284_s3 + $0x8] sm:$0xff] }
  0x17   :  { %1557 = vmatmul.mubr.msk.f32.gmra.mxu1 %vm355_vm0, %v350_v57  ;;  %468 = vmatprep.mubr.f32.mxu0 %v1653_v3  ;;  %v319_v38 = vsel %vm294_vm5, %v316_v33, %v255_v15  ;;  %v101_v39 = vrot.slane %v95_v28, 7  ;;  %v116_v40 = vmul.f32 %v113_v29, %v65_v42  ;;  %v1439_v43 = vadd.f32 -1.0, %v122_v30 }
  0x18   :  { %1559 = vmatprep.mubr.msk.f32.mxu1 %vm355_vm0, %v351_v8  ;;  %881 = vperm.xlu0 %1639, %v847_v9   ;;  %v322_v44 = vsel %vm298_vm6, %v319_v38, %v264_v16  ;;  %v1442_v45 = vadd.f32 -3.0, %v122_v30  ;;  %v170_v46 = vmul.f32 %v164_v36, %v158_v35  ;;  %v176_v47 = vrot.slane %v92_v7, 1  ;;  %v952_v16 = vld [vmem:[%s2286_s5 + $0x38] sm:$0xff] }
  0x19   :  { %v325_v48 = vsel %vm302_vm7, %v322_v44, %v273_v17  ;;  %v107_v49 = vmul.f32 %v101_v39, %v1819_v51  ;;  %v131_v50 = vrot.slane %v1439_v43, 1  ;;  %v149_v52 = vrot.slane %v1439_v43, 2  ;;  %v950_v44 = vld [vmem:[%s2286_s5 + $0x28] sm:$0xff] }
  0x1a   :  { %1449 = vmatmul.mubr.msk.f32.gmra.mxu0 %vm355_vm0, %v351_v8  ;;  %871 = vperm.xlu1 %1640, %v845_v21   ;;  %v146_v54 = vmul.f32 %v1442_v45, %v140_v34  ;;  %v182_v55 = vsub.f32 %v1789_v32, %v176_v47  ;;  %v227_v56 = vrot.slane %v116_v40, 6  ;;  %v263_v57 = vrot.slane %v170_v46, 4 }
  0x1b   :  { %1560 = vmatmul.mubr.msk.f32.gmra.mxu1 %vm355_vm0, %v352_v31  ;;  %474 = vmatprep.mubr.f32.mxu0 %v1653_v3  ;;  %v137_v59 = vmul.f32 %v131_v50, %v119_v14  ;;  %v155_v60 = vmul.f32 %v149_v52, %v119_v14  ;;  %v1897_v61 = vmul.f32 %v1764_v22, %v1764_v22  ;;  %v67_v6 = vrot.slane %v1764_v22, 2 }
  0x1c   :  { %1562 = vmatprep.mubr.msk.f32.mxu1 %vm355_vm0, %v1735_v10  ;;  %866 = vperm.xlu0 %1639, %v844_v37   ;;  %v306_v10 = vsel %vm278_vm1, %v1837_v2, %v107_v49  ;;  %v185_v63 = vmul.f32 %v182_v55, %v1819_v51  ;;  %v245_v0 = vrot.slane %v146_v54, 6  ;;  %v52_v2 = vrot.slane %v1764_v22, 1  ;;  %v841_v51 = vld [vmem:[%s2284_s3] sm:$0xff]  ;;  %v951_v37 = vld [vmem:[%s2286_s5 + $0x30] sm:$0xff] }
  0x1d   :  { %651 = vmatprep.subr.mxu1 %v325_v48  ;;  %v309_v1 = vsel %vm282_vm2, %v306_v10, %v227_v56  ;;  %v236_v4 = vrot.slane %v137_v59, 6  ;;  %v254_v5 = vrot.slane %v155_v60, 3  ;;  %v79_v7 = vrot.slane %v1897_v61, 1  ;;  %v949_v59 = vld [vmem:[%s2286_s5 + $0x20] sm:$0xff] }
  0x1e   :  { %1450 = vmatmul.mubr.msk.f32.gmra.mxu0 %vm355_vm0, %v352_v31  ;;  %861 = vperm.xlu1 %1640, %v843_v58   ;;  %v272_v8 = vrot.slane %v185_v63, 1  ;;  %v94_v9 = vmul.f32 3.0, %v1897_v61  ;;  %v112_v11 = vmul.f32 2.8906114, %v1764_v22  ;;  %v121_v14 = vmul.f32 0.4570458, %v1764_v22 }
  0x1f   :  { %1563 = vmatmul.mubr.msk.f32.gmra.mxu1 %vm355_vm0, %v1770_v23  ;;  %1569 = vmatprep.mubr.msk.f32.mxu0 %vm598_vm8, %v1886_v53  ;;  %v91_v23 = vmul.f32 0.5900436, %v1764_v22  ;;  %v312_v12 = vsel %vm286_vm3, %v309_v1, %v236_v4  ;;  %v85_v13 = vsub.f32 %v1897_v61, %v79_v7  ;;  %v124_v15 = vmul.f32 5.0, %v1897_v61 }
  0x20   :  { %687 = vmatprep.mubr.f32.mxu1 %v1653_v3  ;;  %856 = vperm.xlu0 %1639, %v842_v62   ;;  %v315_v17 = vsel %vm290_vm4, %v312_v12, %v245_v0  ;;  %v97_v18 = vsub.f32 %v94_v9, %v79_v7  ;;  %v115_v21 = vmul.f32 %v112_v11, %v52_v2  ;;  %v142_v24 = vmul.f32 0.37317634, %v1764_v22  ;;  %v948_v0 = vld [vmem:[%s2286_s5 + $0x18] sm:$0xff] }
  0x21   :  { %v318_v28 = vsel %vm294_vm5, %v315_v17, %v254_v5  ;;  %v88_v29 = vmul.f32 0.54627424, %v85_v13  ;;  %v1441_v30 = vadd.f32 -1.0, %v124_v15  ;;  %v1444_v31 = vadd.f32 -3.0, %v124_v15 }
  0x22   :  { %851 = vperm.xlu1 %1640, %v841_v51   ;;  %v321_v33 = vsel %vm298_vm6, %v318_v28, %v263_v57  ;;  %v103_v34 = vrot.slane %v97_v18, 7  ;;  %v118_v35 = vmul.f32 %v115_v21, %v67_v6  ;;  %v160_v36 = vmul.f32 1.4453057, %v1764_v22 }
  0x23   :  { %v324_v38 = vsel %vm302_vm7, %v321_v33, %v272_v8  ;;  %v133_v39 = vrot.slane %v1441_v30, 1  ;;  %v148_v40 = vmul.f32 %v1444_v31, %v142_v24  ;;  %v151_v43 = vrot.slane %v1441_v30, 2 }
  0x24   :  { %990 = vperm.xlu0 %1639, %v952_v16   ;;  %652 = vmatpush1.msra.mxu1 %v324_v38  ;;  %v109_v45 = vmul.f32 %v103_v34, %v91_v23  ;;  %v166_v46 = vrot.slane %v85_v13, 6  ;;  %v178_v47 = vrot.slane %v94_v9, 1  ;;  %v229_v48 = vrot.slane %v118_v35, 6  ;;  %v946_v16 = vld [vmem:[%s2286_s5 + $0x8] sm:$0xff] }
  0x25   :  { %v139_v49 = vmul.f32 %v133_v39, %v121_v14  ;;  %v157_v50 = vmul.f32 %v151_v43, %v121_v14  ;;  %v247_v52 = vrot.slane %v148_v40, 6  ;;  %v42_v54 = vmul.f32 0.48860252, %v1756_v19 }
  0x26   :  { %985 = vperm.xlu1 %1640, %v951_v37   ;;  %v172_v55 = vmul.f32 %v166_v46, %v160_v36  ;;  %v184_v56 = vsub.f32 %v1897_v61, %v178_v47  ;;  %v308_v57 = vsel %vm278_vm1, %v88_v29, %v109_v45  ;;  %v45_v58 = vmul.f32 1.0925485, %v1756_v19 }
  0x27   :  { %v238_v60 = vrot.slane %v139_v49, 6  ;;  %v256_v10 = vrot.slane %v157_v50, 3  ;;  %v311_v62 = vsel %vm282_vm2, %v308_v57, %v229_v48  ;;  %v60_v63 = vmul.f32 0.9461747, %v1777_v25 }
  0x28   :  { %980 = vperm.xlu0 %1639, %v950_v44   ;;  %v187_v1 = vmul.f32 %v184_v56, %v91_v23  ;;  %v265_v4 = vrot.slane %v172_v55, 4  ;;  %v57_v5 = vmul.f32 %v51_v26, %v45_v58  ;;  %v72_v7 = vmul.f32 %v66_v27, %v45_v58  ;;  %v947_v26 = vld [vmem:[%s2286_s5 + $0x10] sm:$0xff] }
  0x29   :  { %v314_v51 = vsel %vm286_vm3, %v311_v62, %v238_v60  ;;  %v1437_v8 = vadd.f32 -0.31539157, %v60_v63  ;;  %v192_v9 = vrot.slane %v42_v54, 5  ;;  %v280_v11 = vsel %vm278_vm1, 0.2820948, %v42_v54  ;;  %v340_v63 = vld [vmem:[%s2285_s1 + $0x8] sm:$0xff] }
  0x2a   :  { %975 = vperm.xlu1 %1640, %v949_v59   ;;  %v274_v25 = vrot.slane %v187_v1, 1  ;;  %v317_v12 = vsel %vm290_vm4, %v314_v51, %v247_v52  ;;  %v201_v13 = vrot.slane %v57_v5, 4  ;;  %v219_v14 = vrot.slane %v72_v7, 1  ;;  %v343_v1 = vld [vmem:[%s2285_s1 + $0x20] sm:$0xff]  ;;  %v345_v5 = vld [vmem:[%s2285_s1 + $0x30] sm:$0xff]  ;;  %v346_v7 = vld [vmem:[%s2285_s1 + $0x38] sm:$0xff] }
  0x2b   :  { %v320_v19 = vsel %vm294_vm5, %v317_v12, %v256_v10  ;;  %v210_v27 = vrot.slane %v1437_v8, 4  ;;  %v284_v23 = vsel %vm282_vm2, %v280_v11, %v42_v54  ;;  %v41_v15 = vmul.f32 0.48860252, %v1758_v20  ;;  %v2057_v51 = vld [vmem:[%s2288_s4] sm:$0xff] }
  0x2c   :  { %970 = vperm.xlu0 %1639, %v948_v0   ;;  %v323_v17 = vsel %vm298_vm6, %v320_v19, %v265_v4  ;;  %v288_v18 = vsel %vm286_vm3, %v284_v23, %v192_v9  ;;  %v44_v21 = vmul.f32 1.0925485, %v1758_v20  ;;  %v59_v24 = vmul.f32 0.9461747, %v1789_v32  ;;  %v945_v32 = vld [vmem:[%s2286_s5] sm:$0xff]  ;;  %v341_v0 = vld [vmem:[%s2285_s1 + $0x10] sm:$0xff] }
  0x2d   :  { %v326_v28 = vsel %vm302_vm7, %v323_v17, %v274_v25  ;;  %v292_v29 = vsel %vm290_vm4, %v288_v18, %v201_v13  ;;  %v191_v30 = vrot.slane %v41_v15, 5  ;;  %v279_v31 = vsel %vm278_vm1, 0.2820948, %v41_v15  ;;  %v344_v4 = vld [vmem:[%s2285_s1 + $0x28] sm:$0xff] }
  0x2e   :  { %965 = vperm.xlu1 %1640, %v947_v26   ;;  %1565 = vmatprep.subr.mxu0 %v326_v28  ;;  %v296_v33 = vsel %vm294_vm5, %v292_v29, %v201_v13  ;;  %v56_v34 = vmul.f32 %v50_v41, %v44_v21  ;;  %v1436_v35 = vadd.f32 -0.31539157, %v59_v24  ;;  %v71_v36 = vmul.f32 %v65_v42, %v44_v21  ;;  %v1261_v41 = vld [vmem:[%s2287_s7] sm:$0xff] }
  0x2f   :  { %v300_v37 = vsel %vm298_vm6, %v296_v33, %v210_v27  ;;  %1566 = vmatpush3.msra.mxu0 %v326_v28  ;;  %v283_v38 = vsel %vm282_vm2, %v279_v31, %v41_v15  ;;  %v43_v39 = vmul.f32 0.48860252, %v1764_v22  ;;  %v46_v40 = vmul.f32 1.0925485, %v1764_v22 }
  0x30   :  { %960 = vperm.xlu0 %1639, %v946_v16   ;;  %v304_v20 = vsel %vm302_vm7, %v300_v37, %v219_v14  ;;  %v200_v42 = vrot.slane %v56_v34, 4  ;;  %v209_v43 = vrot.slane %v1436_v35, 4  ;;  %v218_v44 = vrot.slane %v71_v36, 1 }
  0x31   :  { %653 = vmatprep.subr.mxu1 %v304_v20  ;;  %v287_v45 = vsel %vm286_vm3, %v283_v38, %v191_v30  ;;  %v58_v46 = vmul.f32 %v52_v2, %v46_v40  ;;  %v61_v47 = vmul.f32 0.9461747, %v1897_v61  ;;  %v73_v48 = vmul.f32 %v67_v6, %v46_v40 }
  0x32   :  { %955 = vperm.xlu1 %1640, %v945_v32   ;;  %v291_v49 = vsel %vm290_vm4, %v287_v45, %v200_v42  ;;  %v193_v50 = vrot.slane %v43_v39, 5  ;;  %v281_v52 = vsel %vm278_vm1, 0.2820948, %v43_v39 }
  0x33   :  { %v295_v54 = vsel %vm294_vm5, %v291_v49, %v200_v42  ;;  %v1438_v55 = vadd.f32 -0.31539157, %v61_v47  ;;  %v202_v56 = vrot.slane %v58_v46, 4  ;;  %v285_v2 = vsel %vm282_vm2, %v281_v52, %v43_v39 }
  0x34   :  { %1264 = vperm.xlu0 %1639, %v1261_v41   ;;  %v299_v57 = vsel %vm298_vm6, %v295_v54, %v209_v43  ;;  %v220_v22 = vrot.slane %v73_v48, 1  ;;  %v289_v6 = vsel %vm286_vm3, %v285_v2, %v193_v50 }
  0x35   :  { %v303_v61 = vsel %vm302_vm7, %v299_v57, %v218_v44  ;;  %v211_v58 = vrot.slane %v1438_v55, 4  ;;  %v293_v59 = vsel %vm290_vm4, %v289_v6, %v202_v56 }
  0x36   :  { %654 = vmatpush1.msra.mxu1 %v303_v61  ;;  %v297_v60 = vsel %vm294_vm5, %v293_v59, %v202_v56 }
  0x37   :  { %1461 = vmatmul.mubr.msk.f32.vlgmr.msra.gmra.mxu1 %vm598_vm8, %v1886_v53  ;;  %v301_v10 = vsel %vm298_vm6, %v297_v60, %v211_v58  ;;  %v342_v53 = vld [vmem:[%s2285_s1 + $0x18] sm:$0xff] }
  0x38   :  { %693 = vmatprep.mubr.f32.mxu1 %v1653_v3  ;;  %v305_v62 = vsel %vm302_vm7, %v301_v10, %v220_v22 }
  0x39   :  { %1567 = vmatprep.subr.mxu0 %v305_v62 }
  0x3a   :  { %1568 = vmatpush3.msra.mxu0 %v305_v62 }
  0x3b   :  { %1462 = vmatmul.mubr.msk.f32.gmra.mxu1 %vm598_vm8, %v340_v63  ;;  %1570 = vmatmul.mubr.msk.f32.vlgmr.msra.gmra.mxu0 %vm598_vm8, %v340_v63 }
  0x3c   :  { %699 = vmatprep.mubr.f32.mxu1 %v1653_v3  ;;  %1572 = vmatprep.mubr.msk.f32.mxu0 %vm598_vm8, %v341_v0 }
  0x3f   :  { %1463 = vmatmul.mubr.msk.f32.gmra.mxu1 %vm598_vm8, %v341_v0  ;;  %1573 = vmatmul.mubr.msk.f32.gmra.mxu0 %vm598_vm8, %v342_v53 }
  0x40   :  { %705 = vmatprep.mubr.f32.mxu1 %v1653_v3  ;;  %1575 = vmatprep.mubr.msk.f32.mxu0 %vm598_vm8, %v343_v1 }
  0x43   :  { %1464 = vmatmul.mubr.msk.f32.gmra.mxu1 %vm598_vm8, %v342_v53  ;;  %1576 = vmatmul.mubr.msk.f32.gmra.mxu0 %vm598_vm8, %v344_v4 }
  0x44   :  { %711 = vmatprep.mubr.f32.mxu1 %v1653_v3  ;;  %1578 = vmatprep.mubr.msk.f32.mxu0 %vm598_vm8, %v345_v5 }
  0x47   :  { %1465 = vmatmul.mubr.msk.f32.gmra.mxu1 %vm598_vm8, %v343_v1  ;;  %1579 = vmatmul.mubr.msk.f32.gmra.mxu0 %vm598_vm8, %v346_v7 }
  0x48   :  { %717 = vmatprep.mubr.f32.mxu1 %v1653_v3  ;;  %1082 = vmatprep.mubr.f32.mxu0 %v1653_v3 }
  0x4b   :  { %1466 = vmatmul.mubr.msk.f32.gmra.mxu1 %vm598_vm8, %v344_v4 }
  0x4c   :  { %723 = vmatprep.mubr.f32.mxu1 %v1653_v3 }
  0x4f   :  { %1467 = vmatmul.mubr.msk.f32.gmra.mxu1 %vm598_vm8, %v345_v5 }
  0x50   :  { %729 = vmatprep.mubr.f32.mxu1 %v1653_v3 }
  0x53   :  { %1468 = vmatmul.mubr.msk.f32.gmra.mxu1 %vm598_vm8, %v346_v7 }
  0x54   :  { %1597 = vmatprep.mubr.msk.f32.mxu1 %vm993_vm9, %v2057_v51 }
  0x8f   :  { %v2103_v20 = vpop.permute.xlu0 %886 }
  0x91   :  { %v2109_v46 = vpop.permute.xlu1 %876 }
  0x93   :  { %v882_v49 = vpop.permute.xlu0 %881 }
  0x95   :  { %v2113_v2 = vpop.permute.xlu1 %871 }
  0x97   :  { %v2116_v60 = vpop.permute.xlu0 %866 }
  0xca   :  { %v2061_v8 = vpop.f32.mrf.mxu1  ;;  %v2065_v11 = vpop.f32.mrf.mxu0 }
  0xcc   :  { %v2063_v9 = vpop.f32.mrf.mxu1  ;;  %v2069_v12 = vpop.f32.mrf.mxu0 }
  0xce   :  { %v2073_v14 = vpop.f32.mrf.mxu0 }
  0xcf   :  { %v2067_v25 = vpop.f32.mrf.mxu1 }
  0xd0   :  { %v2075_v19 = vpop.f32.mrf.mxu0 }
  0xd1   :  { %v2071_v13 = vpop.f32.mrf.mxu1 }
  0xd2   :  { %v2079_v23 = vpop.f32.mrf.mxu0 }
  0xd3   :  { %v1555_v26 = vpop.f32.mrf.mxu1 }
  0xd4   :  { %v2081_v16 = vpop.f32.mrf.mxu0 }
  0xd5   :  { %v2077_v27 = vpop.f32.mrf.mxu1 }
  0xd6   :  { %v2083_v18 = vpop.f32.mrf.mxu0 }
  0xd7   :  { %v1558_v15 = vpop.f32.mrf.mxu1 }
  0xd8   :  { %v2085_v24 = vpop.f32.mrf.mxu0 }
  0xd9   :  { %v569_v17 = vpop.f32.mrf.mxu1 }
  0xda   :  { %v2087_v29 = vpop.f32.mrf.mxu0 }
  0xdb   :  { %v1561_v21 = vpop.f32.mrf.mxu1 }
  0xdc   :  { %v2089_v31 = vpop.f32.mrf.mxu0 }
  0xdd   :  { %v579_v28 = vpop.f32.mrf.mxu1 }
  0xde   :  { %v2091_v34 = vpop.f32.mrf.mxu0 }
  0xdf   :  { %v1564_v30 = vpop.f32.mrf.mxu1 }
  0xe0   :  { %v478_v36 = vpop.f32.mrf.mxu0 }
  0xe1   :  { %v589_v33 = vpop.f32.mrf.mxu1 }
  0xf7   :  { %v2093_v35 = vpop.f32.mrf.mxu1 }
  0xf9   :  { %v2095_v32 = vpop.f32.mrf.mxu1 }
  0xfb   :  { %v2097_v37 = vpop.f32.mrf.mxu1  ;;  %v1571_v38 = vpop.f32.mrf.mxu0 }
  0xfd   :  { %v2099_v39 = vpop.f32.mrf.mxu1  ;;  %v802_v40 = vpop.f32.mrf.mxu0 }
  0xff   :  { %v2101_v41 = vpop.f32.mrf.mxu1  ;;  %v1574_v42 = vpop.f32.mrf.mxu0 }
 0x100   :  { %v818_v10 = vadd.f32 %v1574_v42, %v1558_v15  ;;  %v2123_v42 = vpop.permute.xlu0 %856 }
 0x101   :  { %v2105_v43 = vpop.f32.mrf.mxu1  ;;  %v812_v44 = vpop.f32.mrf.mxu0 }
 0x102   :  { %v813_v1 = vadd.f32 %v812_v44, %v569_v17 }
 0x103   :  { %v2107_v45 = vpop.f32.mrf.mxu1  ;;  %v1577_v47 = vpop.f32.mrf.mxu0 }
 0x104   :  { %v828_v55 = vadd.f32 %v1577_v47, %v1561_v21  ;;  %v2120_v21 = vpop.permute.xlu1 %861  ;;  %v803_v47 = vadd.f32 %v802_v40, %v2077_v27 }
 0x105   :  { %v2111_v48 = vpop.f32.mrf.mxu1  ;;  %v822_v50 = vpop.f32.mrf.mxu0  ;;  %v897_v17 = vadd.f32 %v2120_v21, %v813_v1 }
 0x106   :  { %v823_v58 = vadd.f32 %v822_v50, %v579_v28  ;;  %v906_v62 = vadd.f32 %v2109_v46, %v828_v55  ;;  %v808_v28 = vadd.f32 %v1571_v38, %v1555_v26 }
 0x107   :  { %v713_v52 = vpop.f32.mrf.mxu1  ;;  %v1580_v54 = vpop.f32.mrf.mxu0 }
 0x108   :  { %v838_v56 = vadd.f32 %v1580_v54, %v1564_v30  ;;  %v903_v4 = vadd.f32 %v2113_v2, %v823_v58  ;;  %v900_v30 = vadd.f32 %v2116_v60, %v818_v10  ;;  %v894_v38 = vadd.f32 %v2123_v42, %v808_v28  ;;  %v2131_v58 = vpop.permute.xlu1 %851 }
 0x109   :  { %v715_v57 = vpop.f32.mrf.mxu1  ;;  %v832_v61 = vpop.f32.mrf.mxu0 }
 0x10a   :  { %v912_v22 = vadd.f32 %v2103_v20, %v838_v56  ;;  %v833_v6 = vadd.f32 %v832_v61, %v589_v33  ;;  %v930_v33 = vmax.f32 %v906_v62, 0.0  ;;  %v927_v44 = vmax.f32 %v903_v4, 0.0 }
 0x10b   :  { %v719_v59 = vpop.f32.mrf.mxu1  ;;  %v924_v55 = vmax.f32 %v900_v30, 0.0  ;;  %v716_v10 = vadd.f32 %v715_v57, %v2089_v31  ;;  %v692_v4 = vadd.f32 %v2095_v32, %v2069_v12  ;;  %v941_v12 = vld [vmem:[%s2288_s4 + $0x20] sm:$0xff] }
 0x10c   :  { %v936_v63 = vmax.f32 %v912_v22, 0.0  ;;  %v909_v0 = vadd.f32 %v882_v49, %v833_v6  ;;  %v891_v22 = vadd.f32 %v2131_v58, %v803_v47  ;;  %v921_v6 = vmax.f32 %v897_v17, 0.0 }
 0x10d   :  { %v721_v53 = vpop.f32.mrf.mxu1 }
 0x10e   :  { %v933_v5 = vmax.f32 %v909_v0, 0.0  ;;  %1581 = vmatprep.subr.mxu1 %v936_v63  ;;  %v722_v27 = vadd.f32 %v721_v53, %v478_v36  ;;  %v918_v0 = vmax.f32 %v894_v38, 0.0  ;;  %v2219_v38 = vpop.permute.xlu0 %990 }
 0x10f   :  { %v725_v7 = vpop.f32.mrf.mxu1  ;;  %1582 = vmatpush3.msra.mxu1 %v936_v63  ;;  %v714_v63 = vadd.f32 %v713_v52, %v2087_v29  ;;  %v704_v29 = vadd.f32 %v2105_v43, %v2081_v16  ;;  %v939_v16 = vld [vmem:[%s2288_s4 + $0x10] sm:$0xff]  ;;  %v698_v43 = vadd.f32 %v2099_v39, %v2075_v19 }
 0x110   :  { %1583 = vmatprep.subr.mxu1 %v933_v5  ;;  %v726_v56 = vadd.f32 %v725_v7, %v2061_v8  ;;  %v905_v53 = vadd.f32 %v2109_v46, %v722_v27 }
 0x111   :  { %v727_v15 = vpop.f32.mrf.mxu1  ;;  %1584 = vmatpush3.msra.mxu1 %v933_v5  ;;  %v896_v19 = vadd.f32 %v2120_v21, %v704_v29  ;;  %v940_v5 = vld [vmem:[%s2288_s4 + $0x18] sm:$0xff]  ;;  %v893_v32 = vadd.f32 %v2123_v42, %v698_v43 }
 0x112   :  { %1585 = vmatprep.subr.mxu1 %v930_v33  ;;  %v728_v54 = vadd.f32 %v727_v15, %v2063_v9  ;;  %v720_v9 = vadd.f32 %v719_v59, %v2091_v34  ;;  %v907_v36 = vadd.f32 %v882_v49, %v726_v56  ;;  %v708_v59 = vadd.f32 %v2107_v45, %v2083_v18  ;;  %v2221_v56 = vpop.permute.xlu1 %985  ;;  %v2223_v27 = vpop.permute.xlu0 %980 }
 0x113   :  { %v731_v50 = vpop.f32.mrf.mxu1  ;;  %1586 = vmatpush3.msra.mxu1 %v930_v33  ;;  %v702_v18 = vadd.f32 %v2101_v41, %v2079_v23  ;;  %v901_v45 = vadd.f32 %v2113_v2, %v714_v63  ;;  %v929_v1 = vmax.f32 %v905_v53, 0.0  ;;  %v696_v23 = vadd.f32 %v2097_v37, %v2073_v14 }
 0x114   :  { %v732_v26 = vadd.f32 %v731_v50, %v2067_v25  ;;  %1587 = vmatprep.subr.mxu1 %v927_v44  ;;  %v908_v62 = vadd.f32 %v882_v49, %v728_v54  ;;  %v904_v31 = vadd.f32 %v2109_v46, %v720_v9  ;;  %v902_v49 = vadd.f32 %v2113_v2, %v716_v10 }
 0x115   :  { %v733_v61 = vpop.f32.mrf.mxu1  ;;  %1588 = vmatpush3.msra.mxu1 %v927_v44  ;;  %v931_v46 = vmax.f32 %v907_v36, 0.0  ;;  %v898_v41 = vadd.f32 %v2116_v60, %v708_v59  ;;  %v690_v14 = vadd.f32 %v2093_v35, %v2065_v11  ;;  %v895_v37 = vadd.f32 %v2120_v21, %v702_v18  ;;  %v942_v21 = vld [vmem:[%s2288_s4 + $0x28] sm:$0xff]  ;;  %v944_v44 = vld [vmem:[%s2288_s4 + $0x38] sm:$0xff] }
 0x116   :  { %v734_v40 = vadd.f32 %v733_v61, %v2071_v13  ;;  %1589 = vmatprep.subr.mxu1 %v924_v55  ;;  %v910_v25 = vadd.f32 %v2103_v20, %v732_v26  ;;  %v710_v13 = vadd.f32 %v2111_v48, %v2085_v24  ;;  %v932_v52 = vmax.f32 %v908_v62, 0.0  ;;  %v2152_v24 = vld [vmem:[%s2288_s4 + $0x8] sm:$0xff] }
 0x117   :  { %1590 = vmatpush3.msra.mxu1 %v924_v55  ;;  %v928_v2 = vmax.f32 %v904_v31, 0.0  ;;  %v926_v39 = vmax.f32 %v902_v49, 0.0  ;;  %v892_v28 = vadd.f32 %v2123_v42, %v696_v23  ;;  %v922_v30 = vmax.f32 %v898_v41, 0.0  ;;  %v943_v42 = vld [vmem:[%s2288_s4 + $0x30] sm:$0xff] }
 0x118   :  { %v911_v8 = vadd.f32 %v2103_v20, %v734_v40  ;;  %1591 = vmatprep.subr.mxu1 %v921_v6  ;;  %v934_v57 = vmax.f32 %v910_v25, 0.0  ;;  %v915_v20 = vmax.f32 %v891_v22, 0.0  ;;  %v899_v48 = vadd.f32 %v2116_v60, %v710_v13  ;;  %v2225_v22 = vpop.permute.xlu1 %975 }
 0x119   :  { %1592 = vmatpush3.msra.mxu1 %v921_v6  ;;  %v925_v60 = vmax.f32 %v901_v45, 0.0  ;;  %v890_v11 = vadd.f32 %v2131_v58, %v692_v4  ;;  %v920_v35 = vmax.f32 %v896_v19, 0.0  ;;  %v889_v33 = vadd.f32 %v2131_v58, %v690_v14  ;;  %v1260_v4 = vld [vmem:[%s2289_s6] sm:$0xff] }
 0x11a   :  { %v935_v34 = vmax.f32 %v911_v8, 0.0  ;;  %1593 = vmatprep.subr.mxu1 %v918_v0  ;;  %v923_v7 = vmax.f32 %v899_v48, 0.0  ;;  %v919_v15 = vmax.f32 %v895_v37, 0.0  ;;  %v917_v47 = vmax.f32 %v893_v32, 0.0 }
 0x11b   :  { %1594 = vmatpush3.msra.mxu1 %v918_v0  ;;  %v916_v17 = vmax.f32 %v892_v28, 0.0  ;;  %v914_v50 = vmax.f32 %v890_v11, 0.0  ;;  %v913_v54 = vmax.f32 %v889_v33, 0.0  ;;  %v2234_v0 = vpop.permute.xlu0 %970 }
 0x11c   :  { %1034 = vmatprep.subr.mxu0 %v935_v34  ;;  %1595 = vmatprep.subr.mxu1 %v915_v20  ;;  %v2239_v59 = vpop.permute.xlu1 %965 }
 0x11d   :  { %1035 = vmatpush1.msra.mxu0 %v934_v57  ;;  %1596 = vmatpush3.msra.mxu1 %v915_v20 }
 0x11e   :  { %1036 = vmatprep.subr.mxu0 %v932_v52  ;;  %1598 = vmatmul.mubr.msk.f32.vlgmr.msra.gmra.mxu1 %vm993_vm9, %v2152_v24 }
 0x11f   :  { %1037 = vmatpush1.msra.mxu0 %v931_v46  ;;  %1600 = vmatprep.mubr.msk.f32.mxu1 %vm993_vm9, %v939_v16 }
 0x120   :  { %1038 = vmatprep.subr.mxu0 %v929_v1 }
 0x121   :  { %1039 = vmatpush1.msra.mxu0 %v928_v2 }
 0x122   :  { %1040 = vmatprep.subr.mxu0 %v926_v39  ;;  %1601 = vmatmul.mubr.msk.f32.gmra.mxu1 %vm993_vm9, %v940_v5 }
 0x123   :  { %1041 = vmatpush1.msra.mxu0 %v925_v60  ;;  %1603 = vmatprep.mubr.msk.f32.mxu1 %vm993_vm9, %v941_v12 }
 0x124   :  { %1042 = vmatprep.subr.mxu0 %v923_v7 }
 0x125   :  { %1043 = vmatpush1.msra.mxu0 %v922_v30 }
 0x126   :  { %1044 = vmatprep.subr.mxu0 %v920_v35  ;;  %1604 = vmatmul.mubr.msk.f32.gmra.mxu1 %vm993_vm9, %v942_v21 }
 0x127   :  { %1045 = vmatpush1.msra.mxu0 %v919_v15  ;;  %1606 = vmatprep.mubr.msk.f32.mxu1 %vm993_vm9, %v943_v42 }
 0x128   :  { %1046 = vmatprep.subr.mxu0 %v917_v47 }
 0x129   :  { %1047 = vmatpush1.msra.mxu0 %v916_v17 }
 0x12a   :  { %1048 = vmatprep.subr.mxu0 %v914_v50  ;;  %1607 = vmatmul.mubr.msk.f32.gmra.mxu1 %vm993_vm9, %v944_v44 }
 0x12b   :  { %1049 = vmatpush1.msra.mxu0 %v913_v54  ;;  %1334 = vmatprep.mubr.f32.mxu1 %v1653_v3 }
 0x12c   :  { %1477 = vmatmul.mubr.msk.f32.vlgmr.msra.gmra.mxu0 %vm993_vm9, %v2057_v51  ;;  %1609 = vmatprep.subr.mxu0 %v1653_v3 }
 0x12d   :  { %1088 = vmatprep.mubr.f32.mxu0 %v1653_v3 }
 0x130   :  { %1478 = vmatmul.mubr.msk.f32.gmra.mxu0 %vm993_vm9, %v2152_v24  ;;  %v961_v24 = vpop.permute.xlu0 %960 }
 0x131   :  { %1094 = vmatprep.mubr.f32.mxu0 %v1653_v3 }
 0x134   :  { %1479 = vmatmul.mubr.msk.f32.gmra.mxu0 %vm993_vm9, %v939_v16  ;;  %v956_v16 = vpop.permute.xlu1 %955 }
 0x135   :  { %1100 = vmatprep.mubr.f32.mxu0 %v1653_v3 }
 0x138   :  { %1480 = vmatmul.mubr.msk.f32.gmra.mxu0 %vm993_vm9, %v940_v5 }
 0x139   :  { %1106 = vmatprep.mubr.f32.mxu0 %v1653_v3 }
 0x13c   :  { %1481 = vmatmul.mubr.msk.f32.gmra.mxu0 %vm993_vm9, %v941_v12 }
 0x13d   :  { %1112 = vmatprep.mubr.f32.mxu0 %v1653_v3 }
 0x140   :  { %1482 = vmatmul.mubr.msk.f32.gmra.mxu0 %vm993_vm9, %v942_v21 }
 0x141   :  { %1118 = vmatprep.mubr.f32.mxu0 %v1653_v3 }
 0x144   :  { %1483 = vmatmul.mubr.msk.f32.gmra.mxu0 %vm993_vm9, %v943_v42 }
 0x145   :  { %1124 = vmatprep.mubr.f32.mxu0 %v1653_v3 }
 0x148   :  { %1484 = vmatmul.mubr.msk.f32.gmra.mxu0 %vm993_vm9, %v944_v44 }
 0x149   :  { %1625 = vmatprep.mubr.msk.f32.mxu0 %vm1655_vm10, %v1653_v3 }
 0x1de   :  { %v1599_v51 = vpop.f32.mrf.mxu1 }
 0x1df   :  { %v1203_v18 = vadd.f32 %v1599_v51, %v961_v24 }
 0x1e0   :  { %v1197_v26 = vpop.f32.mrf.mxu1 }
 0x1e1   :  { %v1198_v43 = vadd.f32 %v1197_v26, %v956_v16  ;;  %v1241_v23 = vmax.f32 %v1203_v18, 0.0 }
 0x1e2   :  { %v1602_v55 = vpop.f32.mrf.mxu1 }
 0x1e3   :  { %v1213_v31 = vadd.f32 %v1602_v55, %v2234_v0  ;;  %v1238_v2 = vmax.f32 %v1198_v43, 0.0 }
 0x1e4   :  { %v1207_v61 = vpop.f32.mrf.mxu1 }
 0x1e5   :  { %v1208_v29 = vadd.f32 %v1207_v61, %v2239_v59  ;;  %v1247_v45 = vmax.f32 %v1213_v31, 0.0 }
 0x1e6   :  { %v1605_v58 = vpop.f32.mrf.mxu1 }
 0x1e7   :  { %v1223_v62 = vadd.f32 %v1605_v58, %v2223_v27  ;;  %v1244_v48 = vmax.f32 %v1208_v29, 0.0 }
 0x1e8   :  { %v1217_v40 = vpop.f32.mrf.mxu1 }
 0x1e9   :  { %v1218_v13 = vadd.f32 %v1217_v40, %v2225_v22  ;;  %v1253_v57 = vmax.f32 %v1223_v62, 0.0 }
 0x1ea   :  { %v1608_v6 = vpop.f32.mrf.mxu1 }
 0x1eb   :  { %v1233_v9 = vadd.f32 %v1608_v6, %v2219_v38  ;;  %v1250_v49 = vmax.f32 %v1218_v13, 0.0  ;;  %v1265_v13 = vpop.permute.xlu0 %1264 }
 0x1ec   :  { %v2228_v25 = vpop.f32.mrf.mxu0  ;;  %v1227_v10 = vpop.f32.mrf.mxu1 }
 0x1ed   :  { %v1259_v8 = vmax.f32 %v1233_v9, 0.0  ;;  %v1228_v63 = vadd.f32 %v1227_v10, %v2221_v56  ;;  %v1085_v9 = vadd.f32 %v2228_v25, %v956_v16 }
 0x1ee   :  { %v2232_v36 = vpop.f32.mrf.mxu0 }
 0x1ef   :  { %v1256_v53 = vmax.f32 %v1228_v63, 0.0  ;;  %1610 = vmatpush3.msra.mxu0 %v1259_v8 }
 0x1f0   :  { %v2237_v34 = vpop.f32.mrf.mxu0  ;;  %1611 = vmatprep.subr.mxu0 %v1653_v3 }
 0x1f1   :  { %1612 = vmatpush3.msra.mxu0 %v1256_v53 }
 0x1f2   :  { %v2243_v20 = vpop.f32.mrf.mxu0  ;;  %1613 = vmatprep.subr.mxu0 %v1653_v3 }
 0x1f3   :  { %1614 = vmatpush3.msra.mxu0 %v1253_v57  ;;  %v1093_v61 = vadd.f32 %v2243_v20, %v961_v24 }
 0x1f4   :  { %v1096_v52 = vpop.f32.mrf.mxu0  ;;  %1615 = vmatprep.subr.mxu0 %v1653_v3 }
 0x1f5   :  { %1616 = vmatpush3.msra.mxu0 %v1250_v49  ;;  %v1097_v55 = vadd.f32 %v1096_v52, %v2239_v59  ;;  %v1240_v62 = vmax.f32 %v1093_v61, 0.0 }
 0x1f6   :  { %v1098_v46 = vpop.f32.mrf.mxu0  ;;  %1617 = vmatprep.subr.mxu0 %v1653_v3 }
 0x1f7   :  { %1618 = vmatpush3.msra.mxu0 %v1247_v45  ;;  %v1099_v26 = vadd.f32 %v1098_v46, %v2239_v59  ;;  %v1242_v10 = vmax.f32 %v1097_v55, 0.0 }
 0x1f8   :  { %v1102_v1 = vpop.f32.mrf.mxu0  ;;  %1619 = vmatprep.subr.mxu0 %v1653_v3 }
 0x1f9   :  { %1620 = vmatpush3.msra.mxu0 %v1244_v48  ;;  %v1103_v54 = vadd.f32 %v1102_v1, %v2234_v0  ;;  %v1243_v6 = vmax.f32 %v1099_v26, 0.0 }
 0x1fa   :  { %v1104_v41 = vpop.f32.mrf.mxu0  ;;  %1621 = vmatprep.subr.mxu0 %v1653_v3 }
 0x1fb   :  { %1622 = vmatpush3.msra.mxu0 %v1241_v23  ;;  %v1105_v44 = vadd.f32 %v1104_v41, %v2234_v0  ;;  %v1245_v40 = vmax.f32 %v1103_v54, 0.0  ;;  %v1236_v0 = vmax.f32 %v1085_v9, 0.0 }
 0x1fc   :  { %v1108_v19 = vpop.f32.mrf.mxu0  ;;  %1623 = vmatprep.subr.mxu0 %v1653_v3 }
 0x1fd   :  { %1624 = vmatpush3.msra.mxu0 %v1238_v2  ;;  %v1109_v47 = vadd.f32 %v1108_v19, %v2225_v22  ;;  %v1246_v58 = vmax.f32 %v1105_v44, 0.0 }
 0x1fe   :  { %v1110_v39 = vpop.f32.mrf.mxu0  ;;  %1626 = vmatmul.mubr.msk.f32.vlgmr.msra.gmra.mxu0 %vm993_vm9, %v1260_v4 }
 0x1ff   :  { %v1111_v15 = vadd.f32 %v1110_v39, %v2225_v22  ;;  %v1087_v22 = vadd.f32 %v2232_v36, %v956_v16 }
 0x200   :  { %v1114_v5 = vpop.f32.mrf.mxu0 }
 0x201   :  { %v1115_v21 = vadd.f32 %v1114_v5, %v2223_v27  ;;  %v1237_v63 = vmax.f32 %v1087_v22, 0.0 }
 0x202   :  { %v1116_v14 = vpop.f32.mrf.mxu0 }
 0x203   :  { %v1117_v3 = vadd.f32 %v1116_v14, %v2223_v27  ;;  %v1251_v51 = vmax.f32 %v1115_v21, 0.0  ;;  %v1091_v27 = vadd.f32 %v2237_v34, %v961_v24 }
 0x204   :  { %v1120_v37 = vpop.f32.mrf.mxu0 }
 0x205   :  { %v1121_v11 = vadd.f32 %v1120_v37, %v2221_v56  ;;  %v1252_v50 = vmax.f32 %v1117_v3, 0.0  ;;  %v1239_v8 = vmax.f32 %v1091_v27, 0.0 }
 0x206   :  { %v1122_v60 = vpop.f32.mrf.mxu0 }
 0x207   :  { %v1123_v28 = vadd.f32 %v1122_v60, %v2221_v56  ;;  %v1254_v17 = vmax.f32 %v1121_v11, 0.0  ;;  %v1248_v56 = vmax.f32 %v1109_v47, 0.0 }
 0x208   :  { %v1126_v12 = vpop.f32.mrf.mxu0 }
 0x209   :  { %v1127_v32 = vadd.f32 %v1126_v12, %v2219_v38  ;;  %v1255_v42 = vmax.f32 %v1123_v28, 0.0 }
 0x20a   :  { %v1128_v7 = vpop.f32.mrf.mxu0 }
 0x20b   :  { %v1129_v30 = vadd.f32 %v1128_v7, %v2219_v38  ;;  %v1257_v33 = vmax.f32 %v1127_v32, 0.0  ;;  %v1249_v38 = vmax.f32 %v1111_v15, 0.0 }
 0x20d   :  { %v1258_v35 = vmax.f32 %v1129_v30, 0.0 }
 0x20f   :  { %1286 = vmatprep.subr.mxu1 %v1258_v35 }
 0x210   :  { %1287 = vmatpush1.msra.mxu1 %v1257_v33 }
 0x211   :  { %1288 = vmatprep.subr.mxu1 %v1255_v42 }
 0x212   :  { %1289 = vmatpush1.msra.mxu1 %v1254_v17 }
 0x213   :  { %1290 = vmatprep.subr.mxu1 %v1252_v50 }
 0x214   :  { %1291 = vmatpush1.msra.mxu1 %v1251_v51 }
 0x215   :  { %1292 = vmatprep.subr.mxu1 %v1249_v38 }
 0x216   :  { %1293 = vmatpush1.msra.mxu1 %v1248_v56 }
 0x217   :  { %1294 = vmatprep.subr.mxu1 %v1246_v58 }
 0x218   :  { %1295 = vmatpush1.msra.mxu1 %v1245_v40 }
 0x219   :  { %1296 = vmatprep.subr.mxu1 %v1243_v6 }
 0x21a   :  { %1297 = vmatpush1.msra.mxu1 %v1242_v10 }
 0x21b   :  { %1298 = vmatprep.subr.mxu1 %v1240_v62 }
 0x21c   :  { %1299 = vmatpush1.msra.mxu1 %v1239_v8 }
 0x21d   :  { %1300 = vmatprep.subr.mxu1 %v1237_v63 }
 0x21e   :  { %1301 = vmatpush1.msra.mxu1 %v1236_v0 }
 0x21f   :  { %1493 = vmatmul.mubr.msk.f32.vlgmr.msra.gmra.mxu1 %vm993_vm9, %v1260_v4 }
 0x2be   :  { %v1407_v36 = vpop.f32.mrf.mxu0 }
 0x2bf   :  { %v1408_v53 = vadd.f32 %v1407_v36, %v1265_v13 }
 0x2c0   :  { %v1627_v34 = vpop.f32.mrf.mxu0 }
 0x2c1   :  { %v1497_v59 = vmul.f32 -1.442695, %v1408_v53 }
 0x2c3   :  { %1641 = vpow2.f32 %v1497_v59 }
 0x2d0   :  { %v1642_v25 = vpop.eup %1641 }
 0x2d1   :  { %v1422_v31 = vadd.f32 1.0, %v1642_v25 }
 0x2d3   :  { %1643 = vrcp.f32 %v1422_v31 }
 0x2df   :  { %v1336_v57 = vpop.f32.mrf.mxu1 }
 0x2e0   :  { %v1337_v20 = vadd.f32 %v1336_v57, %v1265_v13  ;;  %v1644_v29 = vpop.eup %1643 }
 0x2e1   :  { %v1338_v49 = vpop.f32.mrf.mxu1  ;;  %1431 = vst [vmem:[%s2290_s8 + $0x10] sm:$0xff] %v1644_v29 }
 0x2e2   :  { %v1495_v52 = vmul.f32 -1.442695, %v1337_v20  ;;  %v1339_v24 = vadd.f32 %v1338_v49, %v1265_v13 }
 0x2e4   :  { %1645 = vpow2.f32 %v1495_v52  ;;  %v1496_v18 = vmul.f32 -1.442695, %v1339_v24 }
 0x2e6   :  { %1647 = vpow2.f32 %v1496_v18 }
 0x2f1   :  { %v1646_v45 = vpop.eup %1645 }
 0x2f2   :  { %v1420_v46 = vadd.f32 1.0, %v1646_v45 }
 0x2f3   :  { %v1648_v16 = vpop.eup %1647 }
 0x2f4   :  { %1649 = vrcp.f32 %v1420_v46  ;;  %v1421_v43 = vadd.f32 1.0, %v1648_v16 }
 0x2f6   :  { %1651 = vrcp.f32 %v1421_v43 }
 0x301   :  { %v1650_v48 = vpop.eup %1649 }
 0x302   :  { %1429 = vst [vmem:[%s2290_s8] sm:$0xff] %v1650_v48 }
 0x303   :  { %v1652_v1 = vpop.eup %1651 }
 0x304   :  { %1430 = vst [vmem:[%s2290_s8 + $0x8] sm:$0xff] %v1652_v1 }

</bundles_post_ra>
